<compile_context>
chip_gen: v5e
topology: v5e:2x2
jax: 0.10.0
libtpu: 0.0.40
codegen_flags: <defaults>
</compile_context>

<pallas_src>
import jax
import jax.numpy as jnp
from jax.experimental import pallas as pl
from jax.experimental.pallas import tpu as pltpu

EPS = 1e-12            # F.normalize default eps
EPS_SQ = EPS * EPS     # x / max(||x||, eps) == x * rsqrt(max(||x||^2, eps^2))


# --------------------------------------------------------------------------- #
# Kernels
# --------------------------------------------------------------------------- #
def make_vlad_kernel(n_true, tile_n, need_mask):
    """Stage-1 kernel factory (N, tile sizes, mask flag are static)."""

    def vlad_kernel(x_ref, convw_ref, centers_ref, desc_ref, ax_acc, asum_acc):
        # x_ref:       (C, tile_n) bf16  one spatial tile of one image
        # convw_ref:   (K, C)      bf16  1x1 conv weight (no bias)
        # centers_ref: (K, C)      f32   cluster centers (pre-transposed)
        # desc_ref:    (K, C)      bf16  normalized VLAD descriptor (out)
        # ax_acc:      (K, C)      f32   scratch accumulator  sum_n a*x
        # asum_acc:    (K, 1)      f32   scratch accumulator  sum_n a
        n_idx = pl.program_id(1)

        @pl.when(n_idx == 0)
        def _():
            ax_acc[...] = jnp.zeros_like(ax_acc)
            asum_acc[...] = jnp.zeros_like(asum_acc)

        x = x_ref[...]                                               # (C, tn)

        # 1x1 conv == matmul over channels; f32 accumulation on the MXU.
        scores = jnp.dot(convw_ref[...], x,
                         preferred_element_type=jnp.float32)         # (K, tn)

        # Softmax over the cluster axis (per spatial location); f32 math,
        # divide moved to the EUP via approximate reciprocal.
        m = jnp.max(scores, axis=0, keepdims=True)
        e = jnp.exp(scores - m)
        a = e * pl.reciprocal(jnp.sum(e, axis=0, keepdims=True), approx=True)

        if need_mask:
            # Zero out zero-padded spatial columns (exact: a multiplies both
            # accumulators, so masking a removes their contribution).
            col = (jax.lax.broadcasted_iota(jnp.int32, a.shape, 1)
                   + n_idx * tile_n)
            a = jnp.where(col < n_true, a, 0.0)

        asum_acc[...] += jnp.sum(a, axis=1, keepdims=True)            # (K, 1)
        ax_acc[...] += jax.lax.dot_general(
            a.astype(jnp.bfloat16), x, (((1,), (1,)), ((), ())),
            preferred_element_type=jnp.float32)                       # (K, C)

        @pl.when(n_idx == pl.num_programs(1) - 1)
        def _():
            # vlad[k,c] = sum_n a[k,n]*(x[c,n]-centers[c,k])
            #           = ax[k,c] - centers_t[k,c]*a_sum[k]
            vlad = ax_acc[...] - centers_ref[...] * asum_acc[...]     # (K, C)

            # intra-normalization: L2 over channels (PyTorch dim=1 of (B,C,K))
            in_ssq = jnp.sum(vlad * vlad, axis=1, keepdims=True)      # (K, 1)
            vlad = vlad * jax.lax.rsqrt(jnp.maximum(in_ssq, EPS_SQ))

            # global L2 over the flattened C*K descriptor
            g_ssq = jnp.sum(jnp.sum(vlad * vlad, axis=1, keepdims=True),
                            axis=0, keepdims=True)                    # (1, 1)
            vlad = vlad * jax.lax.rsqrt(jnp.maximum(g_ssq, EPS_SQ))
            desc_ref[...] = vlad.astype(desc_ref.dtype)

    return vlad_kernel


def whiten_kernel(desc_ref, ww_ref, wb_ref, out_ref):
    # desc_ref: (B_pad, C*K)      bf16 -- all images, resident across the grid
    # ww_ref:   (C*K, TILE_OUT)   bf16 -- contiguous pre-tiled weight block
    # wb_ref:   (1, TILE_OUT)     f32
    # out_ref:  (B_pad, TILE_OUT) f32 (un-normalized whiten output)
    out_ref[...] = (
        jnp.dot(desc_ref[...], ww_ref[...],
                preferred_element_type=jnp.float32) + wb_ref[...])


def l2norm_rows_kernel(x_ref, out_ref):
    # Final F.normalize over the output dimension.
    x = x_ref[...]
    ssq = jnp.sum(x * x, axis=1, keepdims=True)
    out_ref[...] = x * jax.lax.rsqrt(jnp.maximum(ssq, EPS_SQ))


# --------------------------------------------------------------------------- #
# Host-side helpers
# --------------------------------------------------------------------------- #
def _round_up(x, m):
    return ((x + m - 1) // m) * m


def _vmem_capacity_bytes():
    try:
        return int(pltpu.get_tpu_info().vmem_capacity_bytes)
    except Exception:
        return 64 * 1024 * 1024           # v7x has the smallest VMEM; safe fallback


def _choose_tile_out(out_dim, ck, vmem_bytes, bytes_per_elem=2):
    """Largest lane-aligned OUT tile (dividing OUT) whose double-buffered bf16
    weight slab fits ~1/2 of VMEM.  v7x (64 MiB) -> 256 at real HLOC sizes,
    v5e/v6e (128 MiB) -> 512."""
    budget = vmem_bytes // 2
    for cand in (1024, 512, 256, 128):
        if out_dim % cand != 0:
            continue
        if 2 * ck * cand * bytes_per_elem > budget:
            continue
        if cand > 128 and out_dim // cand < 2:
            continue
        return cand
    return 128 if out_dim % 128 == 0 else out_dim


def prepare_hloc_netvlad_params(conv_w, centers, whiten_w, whiten_b,
                                tile_out=None):
    """One-time (init-time) parameter preparation.  Must NOT be called on the
    per-forward path: it relayouts / casts the 512 MiB (at real HLOC sizes)
    whiten weight into contiguous bf16 tiles."""
    K, C = conv_w.shape
    OUT, CK = whiten_w.shape
    assert CK == C * K
    if tile_out is None:
        tile_out = _choose_tile_out(OUT, CK, _vmem_capacity_bytes())

    # Permute whiten-weight columns from PyTorch's (C,K) row-major flatten
    # (index c*K + k) to the kernel's (K,C) flatten (index k*C + c), transpose
    # to (CK, OUT), cast to bf16, then pre-tile along OUT so each grid step's
    # weight block is contiguous in HBM.
    ww = whiten_w.reshape(OUT, C, K).transpose(0, 2, 1).reshape(OUT, CK)
    ww = ww.T.astype(jnp.bfloat16)                                  # (CK, OUT)
    n_tiles = OUT // tile_out
    ww_tiled = ww.reshape(CK, n_tiles, tile_out).transpose(1, 0, 2)  # contig blocks

    return {
        "conv_w": conv_w.astype(jnp.bfloat16),                      # (K, C)
        "centers_t": centers.T.astype(jnp.float32),                 # (K, C)
        "ww_tiled": jnp.asarray(ww_tiled),            # (OUT//T, CK, T) bf16
        "wb": whiten_b.reshape(1, OUT).astype(jnp.float32),         # (1, OUT)
    }


def hloc_netvlad_forward(x_nchw, params):
    """x_nchw: (B, C, H, W).  params: output of prepare_hloc_netvlad_params.
    Returns (B, OUT) float32."""
    conv_w = params["conv_w"]          # (K, C) bf16
    centers_t = params["centers_t"]    # (K, C) f32
    ww_tiled = params["ww_tiled"]      # (OUT//T, CK, T) bf16
    wb = params["wb"]                  # (1, OUT) f32

    B, C, H, W = x_nchw.shape
    K = conv_w.shape[0]
    CK = C * K
    n_tiles_out, _, tile_out = ww_tiled.shape
    OUT = n_tiles_out * tile_out
    N = H * W

    vmem = _vmem_capacity_bytes()
    vmem_limit = (3 * vmem) // 4

    def cparams(sem):
        return pltpu.CompilerParams(dimension_semantics=sem,
                                    vmem_limit_bytes=vmem_limit)

    # ---- stage 1: per-image VLAD descriptor in (K, C) layout ---------------
    tile_n = min(512, _round_up(N, 128))
    n_pad = _round_up(N, tile_n)
    n_grid = n_pad // tile_n
    need_mask = n_pad != N

    x_bcn = x_nchw.reshape(B, C, N).astype(jnp.bfloat16)
    if need_mask:
        x_bcn = jnp.pad(x_bcn, ((0, 0), (0, 0), (0, n_pad - N)))

    desc_kc = pl.pallas_call(
        make_vlad_kernel(N, tile_n, need_mask),
        out_shape=jax.ShapeDtypeStruct((B, K, C), jnp.bfloat16),
        grid_spec=pltpu.PrefetchScalarGridSpec(
            num_scalar_prefetch=0,
            grid=(B, n_grid),
            in_specs=[
                pl.BlockSpec((pl.Squeezed(), C, tile_n), lambda b, n: (b, 0, n)),
                pl.BlockSpec((K, C), lambda b, n: (0, 0)),
                pl.BlockSpec((K, C), lambda b, n: (0, 0)),
            ],
            out_specs=pl.BlockSpec((pl.Squeezed(), K, C), lambda b, n: (b, 0, 0)),
            scratch_shapes=[pltpu.VMEM((K, C), jnp.float32),
                            pltpu.VMEM((K, 1), jnp.float32)],
        ),
        compiler_params=cparams(("parallel", "arbitrary")),
    )(x_bcn, conv_w, centers_t)

    # ---- stage 2: whiten Linear, batched over B, tiled over OUT ------------
    b_pad = max(8, _round_up(B, 8))                       # 8-sublane MXU M dim
    desc_flat = desc_kc.reshape(B, CK)                    # already bf16
    if b_pad != B:
        desc_flat = jnp.pad(desc_flat, ((0, b_pad - B), (0, 0)))

    whitened = pl.pallas_call(
        whiten_kernel,
        out_shape=jax.ShapeDtypeStruct((b_pad, OUT), jnp.float32),
        grid_spec=pltpu.PrefetchScalarGridSpec(
            num_scalar_prefetch=0,
            grid=(n_tiles_out,),
            in_specs=[
                pl.BlockSpec((b_pad, CK), lambda j: (0, 0)),
                pl.BlockSpec((pl.Squeezed(), CK, tile_out), lambda j: (j, 0, 0)),
                pl.BlockSpec((1, tile_out), lambda j: (0, j)),
            ],
            out_specs=pl.BlockSpec((b_pad, tile_out), lambda j: (0, j)),
        ),
        compiler_params=cparams(("parallel",)),
    )(desc_flat, ww_tiled, wb)

    # ---- stage 3: final L2 normalization ------------------------------------
    out = pl.pallas_call(
        l2norm_rows_kernel,
        out_shape=jax.ShapeDtypeStruct((b_pad, OUT), jnp.float32),
        grid_spec=pltpu.PrefetchScalarGridSpec(
            num_scalar_prefetch=0,
            grid=(1,),
            in_specs=[pl.BlockSpec((b_pad, OUT), lambda i: (0, 0))],
            out_specs=pl.BlockSpec((b_pad, OUT), lambda i: (0, 0)),
        ),
        compiler_params=cparams(("arbitrary",)),
    )(whitened)

    # Padded rows are garbage-normalized bias rows; never expose them.
    return out[:B]


# --------------------------------------------------------------------------- #
# Plain-JAX reference (faithful f32 mirror of the PyTorch forward)
# --------------------------------------------------------------------------- #
def reference_forward(x_nchw, conv_w, centers, whiten_w, whiten_b):
    B, C, H, W = x_nchw.shape
    flat = x_nchw.reshape(B, C, H * W)
    scores = jnp.einsum('kc,bcn->bkn', conv_w, flat)
    a = jax.nn.softmax(scores, axis=1)
    diff = flat[:, :, None, :] - centers[None, :, :, None]          # (B,C,K,N)
    desc = jnp.sum(a[:, None, :, :] * diff, axis=-1)                # (B,C,K)
    desc = desc / jnp.maximum(
        jnp.linalg.norm(desc, axis=1, keepdims=True), EPS)
    desc = desc.reshape(B, -1)
    desc = desc / jnp.maximum(
        jnp.linalg.norm(desc, axis=1, keepdims=True), EPS)
    desc = desc @ whiten_w.T + whiten_b
    desc = desc / jnp.maximum(
        jnp.linalg.norm(desc, axis=1, keepdims=True), EPS)
    return desc


if __name__ == "__main__":
    # Small shapes consistent with the module semantics.
    B, C, H, W = 2, 4, 16, 16          # desc_dim (C) = 4
    K = 8                              # num_clusters
    OUT = 4096                         # whiten output dim (hard-coded in module)

    key = jax.random.PRNGKey(0)
    kx, kw, kc, kww, kwb = jax.random.split(key, 5)

    x = jax.random.normal(kx, (B, C, H, W), dtype=jnp.float32)
    conv_w = jax.random.normal(kw, (K, C), dtype=jnp.float32) * 0.1     # Conv1d(C,K,1) weight
    centers = jax.random.normal(kc, (C, K), dtype=jnp.float32) * 0.1    # xavier-ish scale
    whiten_w = jax.random.normal(kww, (OUT, C * K), dtype=jnp.float32) * 0.05
    whiten_b = jax.random.normal(kwb, (OUT,), dtype=jnp.float32) * 0.01

    # Init-time preparation (hoisted out of the forward path).
    params = prepare_hloc_netvlad_params(conv_w, centers, whiten_w, whiten_b)
    params = jax.tree_util.tree_map(jax.block_until_ready, params)

    out = hloc_netvlad_forward(x, params)
    out = jax.block_until_ready(out)

    ref = reference_forward(x, conv_w, centers, whiten_w, whiten_b)
    assert out.shape == (B, OUT)
    # Tolerance accounts for bf16 operands in both MXU stages (f32 accumulation,
    # f32 softmax/norm math); measured error is O(1e-4..1e-3) on unit-norm rows.
    max_diff = float(jnp.max(jnp.abs(out - ref)))
    assert jnp.allclose(out, ref, rtol=2e-2, atol=4e-3), (
        "mismatch vs reference: max abs diff = %s" % max_diff)

    print("KERNEL_OK")
</pallas_src>

<mosaic_0001>
module attributes {stable_mosaic.version = 11 : i64} {
  func.func @vlad_kernel(%arg0: i32, %arg1: i32, %arg2: memref<1x4x256xbf16, #tpu.memory_space<vmem>>, %arg3: memref<8x4xbf16, #tpu.memory_space<vmem>>, %arg4: memref<8x4xf32, #tpu.memory_space<vmem>>, %arg5: memref<1x8x4xbf16, #tpu.memory_space<vmem>>, %arg6: memref<8x4xf32, #tpu.memory_space<vmem>>, %arg7: memref<8x1xf32, #tpu.memory_space<vmem>>) attributes {dimension_semantics = [#tpu.dimension_semantics<parallel>, #tpu.dimension_semantics<arbitrary>], iteration_bounds = array<i64: 2, 1>, scalar_prefetch = 0 : i64, scratch_operands = 2 : i64, tpu.core_type = #tpu.core_type<tc>, window_params = [{transform_indices = @transform_0, window_bounds = array<i64: 1, 4, 256>}, {pipeline_mode = #tpu.pipeline_mode<synchronous>, transform_indices = @transform_1, window_bounds = array<i64: 8, 4>}, {pipeline_mode = #tpu.pipeline_mode<synchronous>, transform_indices = @transform_2, window_bounds = array<i64: 8, 4>}, {transform_indices = @transform_3, window_bounds = array<i64: 1, 8, 4>}]} {
    %c0_i32 = arith.constant 0 : i32
    %0 = arith.cmpi eq, %arg1, %c0_i32 : i32
    %1 = arith.extui %0 : i1 to i32
    %c0_i32_0 = arith.constant 0 : i32
    %2 = arith.cmpi ne, %1, %c0_i32_0 : i32
    scf.if %2 {
      %cst_19 = arith.constant 0.000000e+00 : f32
      %30 = vector.broadcast %cst_19 : f32 to vector<8x4xf32>
      %c0_20 = arith.constant 0 : index
      %c0_21 = arith.constant 0 : index
      %31 = vector.load %arg6[%c0_20, %c0_21] : memref<8x4xf32, #tpu.memory_space<vmem>>, vector<8x4xf32>
      tpu.vector_store %arg6[%c0_20, %c0_21], %30 {strides = array<i32>} : memref<8x4xf32, #tpu.memory_space<vmem>>, vector<8x4xf32>,
      %cst_22 = arith.constant 0.000000e+00 : f32
      %32 = vector.broadcast %cst_22 : f32 to vector<8x1xf32>
      %c0_23 = arith.constant 0 : index
      %c0_24 = arith.constant 0 : index
      %33 = vector.load %arg7[%c0_23, %c0_24] : memref<8x1xf32, #tpu.memory_space<vmem>>, vector<8x1xf32>
      tpu.vector_store %arg7[%c0_23, %c0_24], %32 {strides = array<i32>} : memref<8x1xf32, #tpu.memory_space<vmem>>, vector<8x1xf32>,
    } else {
    }
    %c0 = arith.constant 0 : index
    %c0_1 = arith.constant 0 : index
    %c0_2 = arith.constant 0 : index
    %3 = vector.load %arg2[%c0, %c0_1, %c0_2] : memref<1x4x256xbf16, #tpu.memory_space<vmem>>, vector<1x4x256xbf16>
    %4 = vector.shape_cast %3 : vector<1x4x256xbf16> to vector<4x256xbf16>
    %c0_3 = arith.constant 0 : index
    %c0_4 = arith.constant 0 : index
    %5 = vector.load %arg3[%c0_3, %c0_4] : memref<8x4xbf16, #tpu.memory_space<vmem>>, vector<8x4xbf16>
    %cst = arith.constant dense<0.000000e+00> : vector<8x256xf32>
    %6 = tpu.matmul %5, %4, %cst {dimension_numbers = #tpu.dot_dimension_numbers<[1], [0], [0], [1], [0, 0, 1, 1], [], []>} : vector<8x4xbf16>, vector<4x256xbf16>, vector<8x256xf32> -> vector<8x256xf32>
    %cst_5 = arith.constant dense<0xFF800000> : vector<256xf32>
    %7 = vector.multi_reduction <maximumf>, %6, %cst_5 [0] : vector<8x256xf32> to vector<256xf32>
    %8 = vector.shape_cast %7 : vector<256xf32> to vector<1x256xf32>
    %9 = vector.broadcast %8 : vector<1x256xf32> to vector<8x256xf32>
    %10 = arith.subf %6, %9 : vector<8x256xf32>
    %11 = math.exp %10 : vector<8x256xf32>
    %cst_6 = arith.constant dense<0.000000e+00> : vector<256xf32>
    %12 = vector.multi_reduction <add>, %11, %cst_6 [0] : vector<8x256xf32> to vector<256xf32>
    %13 = vector.shape_cast %12 : vector<256xf32> to vector<1x256xf32>
    %14 = tpu.reciprocal %13 {approx = true} : vector<1x256xf32> -> vector<1x256xf32>
    %15 = vector.broadcast %14 : vector<1x256xf32> to vector<8x256xf32>
    %16 = arith.mulf %11, %15 : vector<8x256xf32>
    %c0_7 = arith.constant 0 : index
    %c0_8 = arith.constant 0 : index
    %17 = vector.load %arg7[%c0_7, %c0_8] : memref<8x1xf32, #tpu.memory_space<vmem>>, vector<8x1xf32>
    %cst_9 = arith.constant dense<0.000000e+00> : vector<8xf32>
    %18 = vector.multi_reduction <add>, %16, %cst_9 [1] : vector<8x256xf32> to vector<8xf32>
    %19 = vector.shape_cast %18 : vector<8xf32> to vector<8x1xf32>
    %20 = arith.addf %17, %19 : vector<8x1xf32>
    %c0_10 = arith.constant 0 : index
    %c0_11 = arith.constant 0 : index
    %21 = vector.load %arg7[%c0_10, %c0_11] : memref<8x1xf32, #tpu.memory_space<vmem>>, vector<8x1xf32>
    tpu.vector_store %arg7[%c0_10, %c0_11], %20 {strides = array<i32>} : memref<8x1xf32, #tpu.memory_space<vmem>>, vector<8x1xf32>,
    %c0_12 = arith.constant 0 : index
    %c0_13 = arith.constant 0 : index
    %22 = vector.load %arg6[%c0_12, %c0_13] : memref<8x4xf32, #tpu.memory_space<vmem>>, vector<8x4xf32>
    %23 = arith.truncf %16 : vector<8x256xf32> to vector<8x256xbf16>
    %cst_14 = arith.constant dense<0.000000e+00> : vector<8x4xf32>
    %24 = tpu.matmul %23, %4, %cst_14 {dimension_numbers = #tpu.dot_dimension_numbers<[1], [1], [0], [0], [0, 0, 1, 0], [], []>} : vector<8x256xbf16>, vector<4x256xbf16>, vector<8x4xf32> -> vector<8x4xf32>
    %25 = arith.addf %22, %24 : vector<8x4xf32>
    %c0_15 = arith.constant 0 : index
    %c0_16 = arith.constant 0 : index
    %26 = vector.load %arg6[%c0_15, %c0_16] : memref<8x4xf32, #tpu.memory_space<vmem>>, vector<8x4xf32>
    tpu.vector_store %arg6[%c0_15, %c0_16], %25 {strides = array<i32>} : memref<8x4xf32, #tpu.memory_space<vmem>>, vector<8x4xf32>,
    %c0_i32_17 = arith.constant 0 : i32
    %27 = arith.cmpi eq, %arg1, %c0_i32_17 : i32
    %28 = arith.extui %27 : i1 to i32
    %c0_i32_18 = arith.constant 0 : i32
    %29 = arith.cmpi ne, %28, %c0_i32_18 : i32
    scf.if %29 {
      %c0_19 = arith.constant 0 : index
      %c0_20 = arith.constant 0 : index
      %30 = vector.load %arg6[%c0_19, %c0_20] : memref<8x4xf32, #tpu.memory_space<vmem>>, vector<8x4xf32>
      %c0_21 = arith.constant 0 : index
      %c0_22 = arith.constant 0 : index
      %31 = vector.load %arg4[%c0_21, %c0_22] : memref<8x4xf32, #tpu.memory_space<vmem>>, vector<8x4xf32>
      %c0_23 = arith.constant 0 : index
      %c0_24 = arith.constant 0 : index
      %32 = vector.load %arg7[%c0_23, %c0_24] : memref<8x1xf32, #tpu.memory_space<vmem>>, vector<8x1xf32>
      %33 = vector.broadcast %32 : vector<8x1xf32> to vector<8x4xf32>
      %34 = arith.mulf %31, %33 : vector<8x4xf32>
      %35 = arith.subf %30, %34 : vector<8x4xf32>
      %36 = arith.mulf %35, %35 : vector<8x4xf32>
      %cst_25 = arith.constant dense<0.000000e+00> : vector<8xf32>
      %37 = vector.multi_reduction <add>, %36, %cst_25 [1] : vector<8x4xf32> to vector<8xf32>
      %38 = vector.shape_cast %37 : vector<8xf32> to vector<8x1xf32>
      %cst_26 = arith.constant 1.000000e-24 : f32
      %39 = vector.broadcast %cst_26 : f32 to vector<8x1xf32>
      %40 = arith.maximumf %38, %39 : vector<8x1xf32>
      %41 = math.rsqrt %40 : vector<8x1xf32>
      %42 = vector.broadcast %41 : vector<8x1xf32> to vector<8x4xf32>
      %43 = arith.mulf %35, %42 : vector<8x4xf32>
      %44 = arith.mulf %43, %43 : vector<8x4xf32>
      %cst_27 = arith.constant dense<0.000000e+00> : vector<8xf32>
      %45 = vector.multi_reduction <add>, %44, %cst_27 [1] : vector<8x4xf32> to vector<8xf32>
      %46 = vector.shape_cast %45 : vector<8xf32> to vector<8x1xf32>
      %cst_28 = arith.constant dense<0.000000e+00> : vector<1xf32>
      %47 = vector.multi_reduction <add>, %46, %cst_28 [0] : vector<8x1xf32> to vector<1xf32>
      %48 = vector.shape_cast %47 : vector<1xf32> to vector<1x1xf32>
      %cst_29 = arith.constant 1.000000e-24 : f32
      %49 = vector.broadcast %cst_29 : f32 to vector<1x1xf32>
      %50 = arith.maximumf %48, %49 : vector<1x1xf32>
      %51 = math.rsqrt %50 : vector<1x1xf32>
      %52 = vector.broadcast %51 : vector<1x1xf32> to vector<8x4xf32>
      %53 = arith.mulf %43, %52 : vector<8x4xf32>
      %54 = arith.truncf %53 : vector<8x4xf32> to vector<8x4xbf16>
      %c0_30 = arith.constant 0 : index
      %c0_31 = arith.constant 0 : index
      %c0_32 = arith.constant 0 : index
      %55 = vector.load %arg5[%c0_30, %c0_31, %c0_32] : memref<1x8x4xbf16, #tpu.memory_space<vmem>>, vector<1x8x4xbf16>
      %56 = vector.shape_cast %55 : vector<1x8x4xbf16> to vector<8x4xbf16>
      %57 = vector.shape_cast %54 : vector<8x4xbf16> to vector<1x8x4xbf16>
      tpu.vector_store %arg5[%c0_30, %c0_31, %c0_32], %57 {strides = array<i32>} : memref<1x8x4xbf16, #tpu.memory_space<vmem>>, vector<1x8x4xbf16>,
    } else {
    }
    return
  }
  func.func @transform_0(%arg0: i32, %arg1: i32) -> (i32, i32, i32) {
    %c0_i32 = arith.constant 0 : i32
    %c0_i32_0 = arith.constant 0 : i32
    return %arg0, %c0_i32, %arg1 : i32, i32, i32
  }
  func.func @transform_1(%arg0: i32, %arg1: i32) -> (i32, i32) {
    %c0_i32 = arith.constant 0 : i32
    %c0_i32_0 = arith.constant 0 : i32
    %c0_i32_1 = arith.constant 0 : i32
    return %c0_i32, %c0_i32_0 : i32, i32
  }
  func.func @transform_2(%arg0: i32, %arg1: i32) -> (i32, i32) {
    %c0_i32 = arith.constant 0 : i32
    %c0_i32_0 = arith.constant 0 : i32
    %c0_i32_1 = arith.constant 0 : i32
    return %c0_i32, %c0_i32_0 : i32, i32
  }
  func.func @transform_3(%arg0: i32, %arg1: i32) -> (i32, i32, i32) {
    %c0_i32 = arith.constant 0 : i32
    %c0_i32_0 = arith.constant 0 : i32
    %c0_i32_1 = arith.constant 0 : i32
    return %arg0, %c0_i32, %c0_i32_0 : i32, i32, i32
  }
}

</mosaic_0001>

<bundles_post_ra>
// kernel: tpu_custom_call.1
= control target key start
LH: loop header
LB: loop body
LE: loop exit
PB: predicated region body
PF: predicated region fallthrough
CT: control target
= control target key end

     0   :  { %s543_s12 = smov 0   ;;  %s545_s13 = smov 0   ;;  %s597_s0 = inlined_call_operand.vmem [shape: bf16[2,4,256], index: 0, kind: input, shape index: {}]   ;;  %s598_s1 = inlined_call_operand.vmem [shape: bf16[8,4], index: 1, kind: input, shape index: {}]   ;;  %s599_s2 = inlined_call_operand.vmem [shape: f32[8,4], index: 2, kind: input, shape index: {}]   ;;  %s600_s3 = inlined_call_operand.vmem [shape: bf16[2,8,4], index: 3, kind: output, shape index: {}]  }
   0x1   :  { %s547_s14 = smov 0  }
   0x2 LB: > { %s25_s15 = sadd.s32 1, %s515_s13  ;;  %p449_p0 = scmp.ge.s32.totalorder %s519_s14, 1  ;;  %s519_s14 = sphi %s547_s14, %s13_s14   ;;  %s515_s13 = sphi %s545_s13, %s602_s13   ;;  %s511_s12 = sphi %s543_s12, %s601_s12  }
   0x3   : > { %p27_p1 = scmp.ge.s32.totalorder %s25_s15, 2  ;;  %p156_p2 = scmp.lt.s32.totalorder %s519_s14, 3 }
   0x5   : > { %s604_s15 = smov (%p27_p1, %s25_s15), 0  ;;  %p157_p3 = pnand %p449_p0, %p156_p2 }
   0x6   : > { %p184_p4 = scmp.lt.s32.totalorder (!%p157_p3), %s511_s12, 1 }
   0x7   : > { %160 = sbr.rel (%p157_p3) target bundleno = 743 (0x2e7), region = 32 }
   0xc   : > { %s606_s12 = smov (!%p184_p4, %s511_s12), 1  ;;  %vm216_vm0 = vcmask 1041408   ;;  %vm202_vm1 = vcmask 31744   ;;  %v207_v5 = vld [vmem:[%s598_s1] sm:$0xf]  ;;  %vm204_vm2 = vcmask 7168  }
   0xd   : > { %s457_s16 = sshll.u32 %s606_s12, 2  ;;  %v521_v28 = vmov 0.0   ;;  %v522_v50 = vmov 0   ;;  %v328_v62 = vld [vmem:[%s599_s2] sm:$0xff]  ;;  %vm376_vm9 = vcmask 27648  }
   0xe   : > { %s191_s19 = scalar_lea.vmem %s597_s0, %s457_s16  ;;  %205 = vst.msk [vmem:[#allocation3] sm:$0xff] %vm204_vm2, %v521_v28  ;;  %484 = vset.pattern.permute.xlu0 %v522_v50  ;;  %s196_s26 = scalar_lea.vmem %s600_s3, %s457_s16 }
   0xf   : > { %v206_v0 = vld [vmem:[%s191_s19] sm:$0xf]  ;;  %203 = vst.msk [vmem:[#allocation2] sm:$0xff] %vm202_vm1, %v521_v28 }
  0x10   : > { %209 = vst [vmem:[#allocation1] ss:$4 sm:$0xff] %v206_v0 }
  0x15   : > { %v281_v51 = vld [vmem:[#allocation3] sm:$0xff] }
  0x16   : > { %v288_v56 = vld [vmem:[#allocation2] sm:$0xff] }
  0x17   : > { %v210_v1 = vld.sshfl [vmem:[#allocation1] sm:$0xff pattern:$0x73625140]  ;;  %v211_v2 = vld.sshfl [vmem:[#allocation1 + $0x8] sm:$0xff pattern:$0x73625140] }
  0x18   : > { %v217_v3 = vsel %vm216_vm0, %v210_v1, 0  ;;  %v219_v4 = vsel %vm216_vm0, %v211_v2, 0  ;;  %291 = vst [vmem:[#allocation1] ss:$4 sm:$0xff] %v206_v0 }
  0x19   : > { %228 = vmatpush.bf16.msra.mxu0 %v217_v3  ;;  %241 = vmatpush.bf16.msra.mxu1 %v219_v4 }
  0x1c   : > { %453 = vmatmul.msk.bf16.vlgmr.msra.gmra.mxu0 %vm202_vm1, %v207_v5  ;;  %454 = vmatmul.msk.bf16.vlgmr.msra.gmra.mxu1 %vm202_vm1, %v207_v5 }
  0x1f   : > { %v292_v6 = vld.sshfl [vmem:[#allocation1] sm:$0xff pattern:$0x73625140]  ;;  %v293_v7 = vld.sshfl [vmem:[#allocation1 + $0x8] sm:$0xff pattern:$0x73625140] }
  0x20   : > { %303 = vmatpush.bf16.xpose.msra.mxu2 %v292_v6  ;;  %316 = vmatpush.bf16.xpose.msra.mxu3 %v293_v7 }
  0x99   : > { %v230_v8 = vpop.f32.mrf.mxu0  ;;  %v243_v9 = vpop.f32.mrf.mxu1 }
  0x9a   : > { %v247_v10 = vrot.slane %v230_v8, 4  ;;  %v253_v11 = vrot.slane %v243_v9, 4 }
  0x9c   : > { %v248_v12 = vmax.f32 %v230_v8, %v247_v10  ;;  %v254_v13 = vmax.f32 %v243_v9, %v253_v11 }
  0x9e   : > { %v249_v14 = vrot.slane %v248_v12, 2  ;;  %v255_v15 = vrot.slane %v254_v13, 2 }
  0xa0   : > { %v250_v16 = vmax.f32 %v248_v12, %v249_v14  ;;  %v256_v17 = vmax.f32 %v254_v13, %v255_v15 }
  0xa1   : > { %v232_v18 = vpop.f32.mrf.mxu0  ;;  %v245_v19 = vpop.f32.mrf.mxu1 }
  0xa2   : > { %v251_v20 = vrot.slane %v250_v16, 1  ;;  %v257_v21 = vrot.slane %v256_v17, 1 }
  0xa4   : > { %v252_v22 = vmax.f32 %v250_v16, %v251_v20  ;;  %v258_v23 = vmax.f32 %v256_v17, %v257_v21 }
  0xa6   : > { %v259_v24 = vsub.f32 %v230_v8, %v252_v22  ;;  %v260_v25 = vsub.f32 %v243_v9, %v258_v23 }
  0xa8   : > { %v261_v26 = vmul.f32 1.442695, %v259_v24  ;;  %v263_v27 = vmul.f32 1.442695, %v260_v25 }
  0xaa   : > { %485 = vpow2.f32 %v261_v26 }
  0xab   : > { %487 = vpow2.f32 %v263_v27 }
  0xb0   : > { %v486_v29 = vpop.eup %485 }
  0xb1   : > { %v488_v30 = vpop.eup %487  ;;  %v265_v31 = vrot.slane %v486_v29, 4 }
  0xb2   : > { %v271_v32 = vrot.slane %v488_v30, 4 }
  0xb3   : > { %v266_v33 = vadd.f32 %v486_v29, %v265_v31 }
  0xb4   : > { %v272_v34 = vadd.f32 %v488_v30, %v271_v32 }
  0xb5   : > { %v267_v35 = vrot.slane %v266_v33, 2 }
  0xb6   : > { %v273_v36 = vrot.slane %v272_v34, 2 }
  0xb7   : > { %v268_v37 = vadd.f32 %v267_v35, %v266_v33 }
  0xb8   : > { %v274_v38 = vadd.f32 %v273_v36, %v272_v34 }
  0xb9   : > { %v269_v39 = vrot.slane %v268_v37, 1 }
  0xba   : > { %v275_v40 = vrot.slane %v274_v38, 1 }
  0xbb   : > { %v270_v41 = vadd.f32 %v269_v39, %v268_v37 }
  0xbc   : > { %v276_v42 = vadd.f32 %v275_v40, %v274_v38 }
  0xbd   : > { %489 = vrcp.f32 %v270_v41 }
  0xbe   : > { %491 = vrcp.f32 %v276_v42 }
  0xc3   : > { %v490_v43 = vpop.eup %489 }
  0xc4   : > { %v492_v44 = vpop.eup %491  ;;  %v279_v45 = vmul.f32 %v490_v43, %v486_v29 }
  0xc5   : > { %v280_v46 = vmul.f32 %v492_v44, %v488_v30 }
  0xc6   : > { %v289_v47 = vpack.c.bf16 %v279_v45, %v279_v45 }
  0xc7   : > { %v290_v48 = vpack.c.bf16 %v280_v46, %v280_v46  ;;  %v282_v49 = vadd.f32 %v280_v46, %v279_v45 }
  0xc8   : > { %304 = vmatmul.bf16.vlgmr.msra.gmra.mxu2 %v289_v47 }
  0xc9   : > { %317 = vmatmul.bf16.vlgmr.msra.gmra.mxu3 %v290_v48  ;;  %283 = vadd.xlane.f32.xlu0 %v282_v49 }
 0x13c   : > { %v284_v52 = vpop.xlane.xlu0 %283 }
 0x13d   : > { %v285_v53 = vadd.f32 %v284_v52, %v281_v51 }
 0x13f   : > { %287 = vst.msk [vmem:[#allocation3] sm:$0xff] %vm204_vm2, %v285_v53 }
 0x146   : > { %v329_v54 = vld [vmem:[#allocation3] sm:$0xff] }
 0x147   : > { %332 = vperm.xlu0 %484, %v329_v54  }
 0x14b   : > { %v305_v55 = vpop.f32.mrf.mxu2 }
 0x14c   : > { %v318_v57 = vpop.f32.mrf.mxu3 }
 0x14d   : > { %v319_v58 = vadd.f32 %v318_v57, %v305_v55 }
 0x14f   : > { %v322_v59 = vadd.f32 %v319_v58, %v288_v56 }
 0x151   : > { %323 = vst.msk [vmem:[#allocation2] sm:$0xff] %vm202_vm1, %v322_v59 }
 0x153   : > { %v307_v60 = vpop.f32.mrf.mxu2 }
 0x154   : > { %v320_v61 = vpop.f32.mrf.mxu3 }
 0x158   : > { %v327_v1 = vld [vmem:[#allocation2] sm:$0xff] }
 0x1b9   : > { %v333_v63 = vpop.permute.xlu0 %332 }
 0x1ba   : > { %v335_v0 = vmul.f32 %v333_v63, %v328_v62 }
 0x1bc   : > { %v336_v2 = vsub.f32 %v327_v1, %v335_v0 }
 0x1be   : > { %v337_v3 = vmul.f32 %v336_v2, %v336_v2 }
 0x1c0   : > { %v338_v4 = vsel %vm202_vm1, %v337_v3, 0.0 }
 0x1c1   : > { %339 = vadd.xlane.f32.xlu1 %v338_v4 }
 0x234   : > { %v340_v5 = vpop.xlane.xlu1 %339 }
 0x235   : > { %v341_v6 = vmax.f32 %v340_v5, 1e-24 }
 0x237   : > { %493 = vrsqrt.f32 %v341_v6  ;;  %vm348_vm4 = vweird.f32 %v341_v6 }
 0x23d   : > { %v494_v7 = vpop.eup %493 }
 0x23e   : > { %v343_v8 = vmul.f32 %v494_v7, %v341_v6  ;;  %vm349_vm3 = vweird.f32 %v494_v7 }
 0x23f   : > { %vm350_vm5 = vmor %vm348_vm4, %vm349_vm3 }
 0x240   : > { %v344_v9 = vmul.f32 %v494_v7, %v343_v8 }
 0x242   : > { %v345_v10 = vmul.f32 0.5, %v344_v9 }
 0x244   : > { %v346_v11 = vsub.f32 1.5, %v345_v10 }
 0x246   : > { %v347_v12 = vmul.f32 %v494_v7, %v346_v11 }
 0x248   : > { %v351_v13 = vsel %vm350_vm5, %v494_v7, %v347_v12 }
 0x249   : > { %v352_v14 = vmul.f32 %v351_v13, %v336_v2 }
 0x24b   : > { %v353_v15 = vmul.f32 %v352_v14, %v352_v14 }
 0x24d   : > { %v354_v16 = vsel %vm202_vm1, %v353_v15, 0.0 }
 0x24e   : > { %355 = vadd.xlane.f32.xlu1 %v354_v16 }
 0x2c1   : > { %v356_v17 = vpop.xlane.xlu1 %355 }
 0x2c2   : > { %v357_v18 = vrot.slane %v356_v17, 4 }
 0x2c4   : > { %v358_v19 = vadd.f32 %v357_v18, %v356_v17 }
 0x2c6   : > { %v359_v20 = vrot.slane %v358_v19, 2 }
 0x2c8   : > { %v360_v21 = vadd.f32 %v359_v20, %v358_v19 }
 0x2ca   : > { %v361_v22 = vrot.slane %v360_v21, 1 }
 0x2cc   : > { %v362_v23 = vadd.f32 %v361_v22, %v360_v21 }
 0x2ce   : > { %v363_v24 = vmax.f32 %v362_v23, 1e-24 }
 0x2d0   : > { %495 = vrsqrt.f32 %v363_v24  ;;  %vm370_vm7 = vweird.f32 %v363_v24 }
 0x2d6   : > { %v496_v25 = vpop.eup %495 }
 0x2d7   : > { %v365_v26 = vmul.f32 %v496_v25, %v363_v24  ;;  %vm371_vm6 = vweird.f32 %v496_v25 }
 0x2d8   : > { %vm372_vm8 = vmor %vm370_vm7, %vm371_vm6 }
 0x2d9   : > { %v366_v27 = vmul.f32 %v496_v25, %v365_v26 }
 0x2db   : > { %v367_v28 = vmul.f32 0.5, %v366_v27 }
 0x2dd   : > { %v368_v29 = vsub.f32 1.5, %v367_v28 }
 0x2df   : > { %v369_v30 = vmul.f32 %v496_v25, %v368_v29 }
 0x2e1   : > { %v373_v31 = vsel %vm372_vm8, %v496_v25, %v369_v30 }
 0x2e2   : > { %v374_v32 = vmul.f32 %v373_v31, %v352_v14 }
 0x2e4   : > { %v375_v33 = vpack.c.bf16 %v374_v32, %v374_v32 }
 0x2e6   : > { %377 = vst.msk [vmem:[%s196_s26] sm:$0xf] %vm376_vm9, %v375_v33 }
 0x2e7 PF: > { %s13_s14 = sadd.s32 1, %s519_s14   ;;  %s601_s12 = smov %s515_s13 }
 0x2e8   : > { %p10_p5 = scmp.ge.s32.totalorder %s13_s14, 4   ;;  %s602_s13 = smov %s604_s15 }
 0x2ea   :  { %12 = sbr.rel (!%p10_p5) target bundleno = 2 (0x2), region = 70 }

</bundles_post_ra>
